<compile_context>
chip_gen: v5e
topology: v5e:2x2
jax: 0.10.0
libtpu: 0.0.40
codegen_flags: <defaults>
</compile_context>

<pallas_src>
import functools
import math

import jax
import jax.numpy as jnp
from jax import lax
from jax.experimental import pallas as pl
from jax.experimental.pallas import tpu as pltpu

_LANE = 128
_ROW_TILE = 16                    # multiple of both f32 (8) and bf16 (16) sublane tiles
_GNLL_VAR_EPS = 1e-6              # torch.nn.GaussianNLLLoss default eps (clamp on var)
_LOG_VAR_EPS = math.log(_GNLL_VAR_EPS)
_INV_VAR_EPS = 1.0 / _GNLL_VAR_EPS
_HALF_LOG_2PI = 0.5 * math.log(2.0 * math.pi)


def _tpu_tuning():
    """Returns (max_block_rows, core_splits, vmem_limit_bytes) for this chip."""
    try:
        kind = jax.devices()[0].device_kind.lower()
    except Exception:  # non-TPU / unknown backend: conservative defaults
        kind = ""
    if "v7" in kind or "7x" in kind:
        # 4096x128 f32 = 2 MiB/block; 3 inputs x 2 buffers = 12 MiB, well under
        # v7x's 64 MiB physical VMEM. Two TensorCores -> split the row range.
        return 4096, 2, 28 << 20
    if "v6" in kind:
        # 12 MiB double-buffered footprint fits the 32 MiB default scoped VMEM.
        return 4096, 1, None
    # v5e (16 MiB default scoped VMEM) and unknown chips: 6 MiB footprint.
    return 2048, 1, None


def _elementwise_nll(logvar, diff):
    # GaussianNLLLoss with var = exp(logvar) clamped at eps, one exp/element.
    log_var = jnp.maximum(logvar, _LOG_VAR_EPS)
    inv_var = jnp.minimum(jnp.exp(-logvar), _INV_VAR_EPS)
    return 0.5 * (log_var + diff * diff * inv_var)


def _gnll_kernel(mean_ref, logvar_ref, target_ref, out_ref, *,
                 rows, block_rows, blocks_per_split, num_blocks, has_dup):
    c = pl.program_id(0)          # "parallel" split (megacore on v7x; size 1 elsewhere)
    j = pl.program_id(1)          # "arbitrary" reduction axis
    blk = c * blocks_per_split + j   # logical (unclamped) block index

    # Zero-init must stay unconditional: a core's output slot may only ever see
    # duplicate / overhang blocks.
    @pl.when(j == 0)
    def _():
        out_ref[...] = jnp.zeros_like(out_ref)

    def accumulate(mask_rows):
        mean = mean_ref[...].astype(jnp.float32)
        logvar = logvar_ref[...].astype(jnp.float32)
        target = target_ref[...].astype(jnp.float32)
        diff = mean - target
        if mask_rows:
            # Only the final (row-overhang) block pays for the mask. NOTE:
            # blk*block_rows + row fits int32 for rows < 2^31 (total < 2^38).
            row_ids = lax.broadcasted_iota(jnp.int32, (block_rows, _LANE), 0)
            valid = (blk * block_rows + row_ids) < rows
            logvar = jnp.where(valid, logvar, 0.0)   # -> loss contribution 0
            diff = jnp.where(valid, diff, 0.0)
        loss = _elementwise_nll(logvar, diff)
        # Per-lane partial sums; cross-lane reduce happens once in the wrapper.
        out_ref[...] += jnp.sum(loss, axis=0, keepdims=True)

    has_overhang = (rows % block_rows) != 0
    last = num_blocks - 1

    if not has_overhang and not has_dup:
        # Fast path: every grid step is a full, valid block. No masks, no when.
        accumulate(False)
    elif has_overhang:
        if num_blocks > 1:
            @pl.when(blk < last)
            def _():
                accumulate(False)

        @pl.when(blk == last)          # clamped duplicates (blk > last) skip compute
        def _():
            accumulate(True)
    else:
        @pl.when(blk < num_blocks)     # skip clamped duplicate blocks entirely
        def _():
            accumulate(False)


def gnll_loss(mean, logvar, target, use_constant=False, block_rows_cap=None):
    """Pallas implementation of the GNLL module forward pass.

    block_rows_cap is a test-only hook (must be a multiple of 8 for f32 inputs)
    used to force multi-block grids at small sizes.
    """
    assert mean.shape == logvar.shape == target.shape
    n_batch = target.shape[0]
    total = int(mean.size)

    mean_f = mean.reshape(-1)        # contiguous reshape: no data movement
    logvar_f = logvar.reshape(-1)
    target_f = target.reshape(-1)

    rows = total // _LANE
    aligned = rows * _LANE
    tail = total - aligned

    max_rows, splits, vmem_limit = _tpu_tuning()
    if block_rows_cap is not None:
        max_rows = min(max_rows, int(block_rows_cap))

    loss_sum = jnp.float32(0.0)

    if rows > 0:
        if tail == 0:
            # Common case: free reshape to a lane-dense (rows, 128) slab.
            m2 = mean_f.reshape(rows, _LANE)
            lv2 = logvar_f.reshape(rows, _LANE)
            t2 = target_f.reshape(rows, _LANE)
        else:
            # Kernel covers the 128-aligned prefix only; the <128-element
            # ragged tail is added with plain jnp below (no padded copies).
            m2 = mean_f[:aligned].reshape(rows, _LANE)
            lv2 = logvar_f[:aligned].reshape(rows, _LANE)
            t2 = target_f[:aligned].reshape(rows, _LANE)

        # Block sizing: biggest lane-dense tile that fits the VMEM budget,
        # rounded to the sublane tile, trying to give each core >= 1 block.
        rows_per_split = pl.cdiv(rows, splits)
        block_rows = min(max_rows, pl.cdiv(rows_per_split, _ROW_TILE) * _ROW_TILE)
        if block_rows >= rows:
            block_rows = rows          # full extent: no split needed
            splits = 1
        num_blocks = pl.cdiv(rows, block_rows)
        if num_blocks < splits:
            splits = 1
        blocks_per_split = pl.cdiv(num_blocks, splits)
        has_dup = splits * blocks_per_split != num_blocks
        last = num_blocks - 1

        if has_dup:
            # Clamp so the DMA never targets a fully out-of-bounds block; the
            # kernel skips compute for those via the logical (unclamped) index.
            def in_map(c, j):
                return (jnp.minimum(c * blocks_per_split + j, last), 0)
        else:
            def in_map(c, j):
                return (c * blocks_per_split + j, 0)

        in_spec = pl.BlockSpec((block_rows, _LANE), in_map)

        kernel = functools.partial(
            _gnll_kernel,
            rows=rows,
            block_rows=block_rows,
            blocks_per_split=blocks_per_split,
            num_blocks=num_blocks,
            has_dup=has_dup,
        )

        itemsize = jnp.dtype(mean.dtype).itemsize
        cost = pl.CostEstimate(
            flops=8 * aligned,
            transcendentals=aligned,
            bytes_accessed=3 * aligned * itemsize + splits * _LANE * 4,
        )

        out = pl.pallas_call(
            kernel,
            out_shape=jax.ShapeDtypeStruct((splits, _LANE), jnp.float32),
            grid_spec=pltpu.PrefetchScalarGridSpec(
                num_scalar_prefetch=0,
                grid=(splits, blocks_per_split),
                in_specs=[in_spec, in_spec, in_spec],
                out_specs=pl.BlockSpec((1, _LANE), lambda c, j: (c, 0)),
            ),
            compiler_params=pltpu.CompilerParams(
                dimension_semantics=("parallel", "arbitrary"),
                vmem_limit_bytes=vmem_limit,
            ),
            cost_estimate=cost,
        )(m2, lv2, t2)

        loss_sum = jnp.sum(out)

    if tail > 0:
        # Ragged tail (< 128 elements): negligible cost in plain jnp; avoids
        # materializing padded copies of all three inputs in HBM.
        mt = mean_f[aligned:].astype(jnp.float32)
        lt = logvar_f[aligned:].astype(jnp.float32)
        tt = target_f[aligned:].astype(jnp.float32)
        loss_sum = loss_sum + jnp.sum(_elementwise_nll(lt, mt - tt))

    if use_constant:  # full=True adds 0.5*log(2*pi) per element
        loss_sum = loss_sum + jnp.float32(_HALF_LOG_2PI * total)

    eps32 = jnp.finfo(jnp.float32).eps  # self.EPS in the torch module
    return loss_sum / (jnp.float32(n_batch) + eps32)


def _reference(mean, logvar, target, use_constant=False):
    var = jnp.maximum(jnp.exp(logvar.astype(jnp.float32)), _GNLL_VAR_EPS)
    diff = mean.astype(jnp.float32) - target.astype(jnp.float32)
    loss = 0.5 * (jnp.log(var) + diff * diff / var)
    if use_constant:
        loss = loss + _HALF_LOG_2PI
    return jnp.sum(loss) / (target.shape[0] + jnp.finfo(jnp.float32).eps)


if __name__ == "__main__":
    key = jax.random.PRNGKey(0)
    k1, k2, k3 = jax.random.split(key, 3)

    # Small NCHW shapes consistent with the module's forward. total=2048 is a
    # multiple of 128 -> zero-copy fast path, single block.
    shape = (2, 4, 16, 16)
    mean = jax.random.normal(k1, shape, dtype=jnp.float32)
    logvar = 0.5 * jax.random.normal(k2, shape, dtype=jnp.float32)
    y_true = jax.random.normal(k3, shape, dtype=jnp.float32)

    out = jax.block_until_ready(gnll_loss(mean, logvar, y_true, use_constant=False))
    ref = _reference(mean, logvar, y_true, use_constant=False)
    assert jnp.allclose(out, ref, rtol=1e-5, atol=1e-5), (out, ref)

    out_full = jax.block_until_ready(gnll_loss(mean, logvar, y_true, use_constant=True))
    ref_full = _reference(mean, logvar, y_true, use_constant=True)
    assert jnp.allclose(out_full, ref_full, rtol=1e-5, atol=1e-5), (out_full, ref_full)

    # Ragged element count (total % 128 != 0): aligned-prefix kernel + jnp tail.
    shape_r = (2, 3, 5, 7)
    mean_r = jax.random.normal(k1, shape_r, dtype=jnp.float32)
    logvar_r = 0.5 * jax.random.normal(k2, shape_r, dtype=jnp.float32)
    y_true_r = jax.random.normal(k3, shape_r, dtype=jnp.float32)
    out_r = jax.block_until_ready(gnll_loss(mean_r, logvar_r, y_true_r))
    ref_r = _reference(mean_r, logvar_r, y_true_r)
    assert jnp.allclose(out_r, ref_r, rtol=1e-5, atol=1e-5), (out_r, ref_r)

    # Multi-block grid with a row-overhang final block (exercises the masked
    # pl.when path): 1152 elems -> 9 rows, capped at 8-row blocks -> 2 blocks.
    shape_m = (2, 4, 9, 16)
    mean_m = jax.random.normal(k1, shape_m, dtype=jnp.float32)
    logvar_m = 0.5 * jax.random.normal(k2, shape_m, dtype=jnp.float32)
    y_true_m = jax.random.normal(k3, shape_m, dtype=jnp.float32)
    out_m = jax.block_until_ready(gnll_loss(mean_m, logvar_m, y_true_m, block_rows_cap=8))
    ref_m = _reference(mean_m, logvar_m, y_true_m)
    assert jnp.allclose(out_m, ref_m, rtol=1e-5, atol=1e-5), (out_m, ref_m)

    print("KERNEL_OK")
</pallas_src>

<mosaic_0001>
module attributes {stable_mosaic.version = 11 : i64} {
  func.func @_gnll_kernel(%arg0: i32, %arg1: i32, %arg2: memref<16x128xf32, #tpu.memory_space<vmem>>, %arg3: memref<16x128xf32, #tpu.memory_space<vmem>>, %arg4: memref<16x128xf32, #tpu.memory_space<vmem>>, %arg5: memref<1x128xf32, #tpu.memory_space<vmem>>) attributes {dimension_semantics = [#tpu.dimension_semantics<parallel>, #tpu.dimension_semantics<arbitrary>], iteration_bounds = array<i64: 1, 1>, scalar_prefetch = 0 : i64, scratch_operands = 0 : i64, tpu.core_type = #tpu.core_type<tc>, window_params = [{transform_indices = @transform_0, window_bounds = array<i64: 16, 128>}, {transform_indices = @transform_1, window_bounds = array<i64: 16, 128>}, {transform_indices = @transform_2, window_bounds = array<i64: 16, 128>}, {transform_indices = @transform_3, window_bounds = array<i64: 1, 128>}]} {
    %c0_i32 = arith.constant 0 : i32
    %0 = arith.cmpi eq, %arg1, %c0_i32 : i32
    %1 = arith.extui %0 : i1 to i32
    %c0_i32_0 = arith.constant 0 : i32
    %2 = arith.cmpi ne, %1, %c0_i32_0 : i32
    scf.if %2 {
      %cst_14 = arith.constant 0.000000e+00 : f32
      %24 = vector.broadcast %cst_14 : f32 to vector<1x128xf32>
      %c0_15 = arith.constant 0 : index
      %c0_16 = arith.constant 0 : index
      %25 = vector.load %arg5[%c0_15, %c0_16] : memref<1x128xf32, #tpu.memory_space<vmem>>, vector<1x128xf32>
      tpu.vector_store %arg5[%c0_15, %c0_16], %24 {strides = array<i32>} : memref<1x128xf32, #tpu.memory_space<vmem>>, vector<1x128xf32>,
    } else {
    }
    %c0 = arith.constant 0 : index
    %c0_1 = arith.constant 0 : index
    %3 = vector.load %arg2[%c0, %c0_1] : memref<16x128xf32, #tpu.memory_space<vmem>>, vector<16x128xf32>
    %c0_2 = arith.constant 0 : index
    %c0_3 = arith.constant 0 : index
    %4 = vector.load %arg3[%c0_2, %c0_3] : memref<16x128xf32, #tpu.memory_space<vmem>>, vector<16x128xf32>
    %c0_4 = arith.constant 0 : index
    %c0_5 = arith.constant 0 : index
    %5 = vector.load %arg4[%c0_4, %c0_5] : memref<16x128xf32, #tpu.memory_space<vmem>>, vector<16x128xf32>
    %6 = arith.subf %3, %5 : vector<16x128xf32>
    %cst = arith.constant -13.8155107 : f32
    %7 = vector.broadcast %cst : f32 to vector<16x128xf32>
    %8 = arith.maximumf %4, %7 : vector<16x128xf32>
    %cst_6 = arith.constant 0.000000e+00 : f32
    %9 = vector.broadcast %cst_6 : f32 to vector<16x128xf32>
    %10 = arith.subf %9, %4 : vector<16x128xf32>
    %11 = math.exp %10 : vector<16x128xf32>
    %cst_7 = arith.constant 1.000000e+06 : f32
    %12 = vector.broadcast %cst_7 : f32 to vector<16x128xf32>
    %13 = arith.minimumf %11, %12 : vector<16x128xf32>
    %14 = arith.mulf %6, %6 : vector<16x128xf32>
    %15 = arith.mulf %14, %13 : vector<16x128xf32>
    %16 = arith.addf %8, %15 : vector<16x128xf32>
    %cst_8 = arith.constant 5.000000e-01 : f32
    %17 = vector.broadcast %cst_8 : f32 to vector<16x128xf32>
    %18 = arith.mulf %17, %16 : vector<16x128xf32>
    %c0_9 = arith.constant 0 : index
    %c0_10 = arith.constant 0 : index
    %19 = vector.load %arg5[%c0_9, %c0_10] : memref<1x128xf32, #tpu.memory_space<vmem>>, vector<1x128xf32>
    %cst_11 = arith.constant dense<0.000000e+00> : vector<128xf32>
    %20 = vector.multi_reduction <add>, %18, %cst_11 [0] : vector<16x128xf32> to vector<128xf32>
    %21 = vector.shape_cast %20 : vector<128xf32> to vector<1x128xf32>
    %22 = arith.addf %19, %21 : vector<1x128xf32>
    %c0_12 = arith.constant 0 : index
    %c0_13 = arith.constant 0 : index
    %23 = vector.load %arg5[%c0_12, %c0_13] : memref<1x128xf32, #tpu.memory_space<vmem>>, vector<1x128xf32>
    tpu.vector_store %arg5[%c0_12, %c0_13], %22 {strides = array<i32>} : memref<1x128xf32, #tpu.memory_space<vmem>>, vector<1x128xf32>,
    return
  }
  func.func @transform_0(%arg0: i32, %arg1: i32) -> (i32, i32) {
    %c1_i32 = arith.constant 1 : i32
    %0 = arith.muli %arg0, %c1_i32 : i32
    %1 = arith.addi %0, %arg1 : i32
    %c0_i32 = arith.constant 0 : i32
    %c0_i32_0 = arith.constant 0 : i32
    return %1, %c0_i32 : i32, i32
  }
  func.func @transform_1(%arg0: i32, %arg1: i32) -> (i32, i32) {
    %c1_i32 = arith.constant 1 : i32
    %0 = arith.muli %arg0, %c1_i32 : i32
    %1 = arith.addi %0, %arg1 : i32
    %c0_i32 = arith.constant 0 : i32
    %c0_i32_0 = arith.constant 0 : i32
    return %1, %c0_i32 : i32, i32
  }
  func.func @transform_2(%arg0: i32, %arg1: i32) -> (i32, i32) {
    %c1_i32 = arith.constant 1 : i32
    %0 = arith.muli %arg0, %c1_i32 : i32
    %1 = arith.addi %0, %arg1 : i32
    %c0_i32 = arith.constant 0 : i32
    %c0_i32_0 = arith.constant 0 : i32
    return %1, %c0_i32 : i32, i32
  }
  func.func @transform_3(%arg0: i32, %arg1: i32) -> (i32, i32) {
    %c0_i32 = arith.constant 0 : i32
    %c0_i32_0 = arith.constant 0 : i32
    return %arg0, %c0_i32 : i32, i32
  }
}

</mosaic_0001>

<bundles_post_ra>
// kernel: tpu_custom_call.1
= control target key start
LH: loop header
LB: loop body
LE: loop exit
PB: predicated region body
PF: predicated region fallthrough
CT: control target
= control target key end

     0   :  { %8 = vsyncpa [#allocation3], 0  ;;  %s291_s0 = inlined_call_operand.hbm [shape: f32[16,128], index: 0, kind: input, shape index: {}]   ;;  %s292_s1 = inlined_call_operand.hbm [shape: f32[16,128], index: 1, kind: input, shape index: {}]   ;;  %s293_s2 = inlined_call_operand.hbm [shape: f32[16,128], index: 2, kind: input, shape index: {}]   ;;  %s294_s3 = inlined_call_operand.hbm [shape: f32[1,128], index: 3, kind: output, shape index: {}]  }
   0x1   :  { %9 = vsyncpa [#allocation6], 0 }
   0x2   :  { %10 = vsyncpa [#allocation4], 0  ;;  %s36_s14 = sshll.u32 %s292_s1, 4  ;;  %s252_s15 = smov [#allocation5]   ;;  %s37_s14 = int_to_ptr.hbm [resolvable:$true] %s36_s14 }
   0x3   :  { %s38_s16 = sshll.u32 %s252_s15, 4  ;;  %s19_s19 = sshll.u32 %s291_s0, 4  ;;  %s39_s16 = int_to_ptr.vmem [resolvable:$true] %s38_s16  ;;  %s20_s19 = int_to_ptr.hbm [resolvable:$true] %s19_s19 }
   0x4   :  { %s253_s20 = smov 128   ;;  %s254_s21 = smov 8  }
   0x5   :  { %44 = dma.hbm_to_vmem [thread:$0]  %s37_s14, 256, %s39_s16, [#allocation6], %s253_s20, %s253_s20, %s254_s21  }
   0x6   :  { %s255_s22 = smov [#allocation2]   ;;  %s53_s26 = sshll.u32 %s293_s2, 4  ;;  %s54_s26 = int_to_ptr.hbm [resolvable:$true] %s53_s26 }
   0x7   :  { %s21_s23 = sshll.u32 %s255_s22, 4  ;;  %s256_s1 = smov [#allocation7]   ;;  %s22_s23 = int_to_ptr.vmem [resolvable:$true] %s21_s23 }
   0x8   :  { %27 = dma.hbm_to_vmem [thread:$0]  %s20_s19, 256, %s22_s23, [#allocation3], %s253_s20, %s253_s20, %s254_s21  }
   0x9   :  { %s55_s27 = sshll.u32 %s256_s1, 4  ;;  %s56_s27 = int_to_ptr.vmem [resolvable:$true] %s55_s27 }
   0xa   :  { %61 = dma.hbm_to_vmem [thread:$0]  %s54_s26, 256, %s56_s27, [#allocation6], %s253_s20, %s253_s20, %s254_s21  }
   0xb   :  { %246 = dma.done.wait [#allocation3], 256  }
   0xc   :  { %247 = vsyncadd [#allocation3], 4294967040 }
   0xd   :  { %248 = dma.done.wait [#allocation6], 512  }
   0xe   :  { %249 = vsyncadd [#allocation6], 4294966784  ;;  %v257_v0 = vmov 0.0   ;;  %v87_v1 = vld [vmem:[#allocation5] sm:$0xff]  ;;  %v88_v2 = vld [vmem:[#allocation5 + $0x8] sm:$0xff]  ;;  %s258_s0 = smov [#allocation8]  }
   0xf   :  { %84 = vst [vmem:[#allocation8] sm:$0x1] %v257_v0  ;;  %v95_v3 = vsub.f32 0.0, %v87_v1  ;;  %v96_v4 = vsub.f32 0.0, %v88_v2  ;;  %v85_v5 = vld [vmem:[#allocation2] sm:$0xff]  ;;  %v86_v8 = vld [vmem:[#allocation2 + $0x8] sm:$0xff] }
  0x10   :  { %v89_v6 = vld [vmem:[#allocation7] sm:$0xff]  ;;  %v90_v9 = vld [vmem:[#allocation7 + $0x8] sm:$0xff]  ;;  %v93_v17 = vmax.f32 %v87_v1, -13.815511  ;;  %v94_v19 = vmax.f32 %v88_v2, -13.815511 }
  0x11   :  { %v97_v7 = vmul.f32 1.442695, %v95_v3  ;;  %v99_v10 = vmul.f32 1.442695, %v96_v4  ;;  %v91_v11 = vsub.f32 %v85_v5, %v89_v6  ;;  %v92_v12 = vsub.f32 %v86_v8, %v90_v9  ;;  %s126_s2 = sshll.u32 %s258_s0, 4  ;;  %s128_s30 = sshll.u32 %s294_s3, 4  ;;  %s127_s2 = int_to_ptr.vmem [resolvable:$true] %s126_s2  ;;  %s129_s30 = int_to_ptr.hbm [resolvable:$true] %s128_s30 }
  0x13   :  { %146 = vpow2.f32 %v97_v7  ;;  %v103_v13 = vmul.f32 %v91_v11, %v91_v11  ;;  %v104_v15 = vmul.f32 %v92_v12, %v92_v12 }
  0x14   :  { %148 = vpow2.f32 %v99_v10 }
  0x16   :  { %v111_v33 = vld [vmem:[#allocation8] sm:$0x1] }
  0x19   :  { %v147_v14 = vpop.eup %146 }
  0x1a   :  { %v149_v16 = vpop.eup %148  ;;  %v101_v18 = vmin.f32 %v147_v14, 1000000.0 }
  0x1b   :  { %v102_v20 = vmin.f32 %v149_v16, 1000000.0 }
  0x1c   :  { %v105_v21 = vmul.f32 %v103_v13, %v101_v18 }
  0x1d   :  { %v106_v22 = vmul.f32 %v104_v15, %v102_v20 }
  0x1e   :  { %v107_v23 = vadd.f32 %v105_v21, %v93_v17 }
  0x1f   :  { %v108_v24 = vadd.f32 %v106_v22, %v94_v19 }
  0x20   :  { %v109_v25 = vmul.f32 0.5, %v107_v23 }
  0x21   :  { %v110_v26 = vmul.f32 0.5, %v108_v24 }
  0x23   :  { %v112_v27 = vadd.f32 %v110_v26, %v109_v25 }
  0x25   :  { %v113_v28 = vrot.slane %v112_v27, 4 }
  0x27   :  { %v114_v29 = vadd.f32 %v113_v28, %v112_v27 }
  0x29   :  { %v115_v30 = vrot.slane %v114_v29, 2 }
  0x2b   :  { %v116_v31 = vadd.f32 %v115_v30, %v114_v29 }
  0x2d   :  { %v117_v32 = vrot.slane %v116_v31, 1 }
  0x2f   :  { %v118_v34 = vadd.f32 %v117_v32, %v116_v31 }
  0x31   :  { %v119_v35 = vadd.f32 %v118_v34, %v111_v33 }
  0x33   :  { %120 = vst [vmem:[#allocation8] sm:$0x1] %v119_v35 }
  0x34   :  { %131 = dma.vmem_to_hbm [thread:$0]  %s127_s2, 16, %s129_s30, [#allocation4]  }
  0x35   :  { %250 = dma.done.wait [#allocation4], 16  }
  0x36   :  { %251 = vsyncadd [#allocation4], 4294967280 }
  0x37   :  { %136 = vsyncpa [#allocation3], 1 }
  0x38   :  { %137 = vsyncpa [#allocation6], 1 }
  0x39   :  { %138 = vsyncpa [#allocation4], 1 }

</bundles_post_ra>
